<compile_context>
chip_gen: v5e
topology: v5e:2x2
jax: 0.10.0
libtpu: 0.0.40
codegen_flags: <defaults>
</compile_context>

<pallas_src>
import jax
import jax.numpy as jnp
from jax.experimental import pallas as pl
from jax.experimental.pallas import tpu as pltpu


def transition_kernel(x_ref, ss_ref, w_ref, o_ref):
    # x_ref:  (1, 2, 2, TM, Cin) bf16  pre-BN activations; axes 1,2 are the 2x2
    #                                  pool siblings, TM pooled pixels, Cin lanes
    # ss_ref: (2, 1, Cin) f32          row 0 = gamma/sqrt(var+eps), row 1 = shift
    # w_ref:  (Cin, Cout_pad) bf16     1x1 conv weight, 0.25 pool factor folded in
    # o_ref:  (1, TM, Cout_pad) bf16
    scale = ss_ref[0]          # (1, Cin) f32
    shift = ss_ref[1]          # (1, Cin) f32

    def bn_relu(a):            # (TM, Cin) bf16 -> (TM, Cin) f32 on the VPU
        return jnp.maximum(a.astype(jnp.float32) * scale + shift, 0.0)

    # 2x2 average pool of the post-ReLU activation (the 1/4 lives in w_ref).
    p = (bn_relu(x_ref[0, 0, 0]) + bn_relu(x_ref[0, 0, 1]) +
         bn_relu(x_ref[0, 1, 0]) + bn_relu(x_ref[0, 1, 1]))      # (TM, Cin) f32

    # 1x1 conv == matmul over channels; bf16 MXU inputs, f32 accumulator.
    z = jnp.dot(p.astype(w_ref.dtype), w_ref[...],
                preferred_element_type=jnp.float32)              # (TM, Cout_pad)
    o_ref[0] = z.astype(o_ref.dtype)


def _cdiv(a, b):
    return (a + b - 1) // b


def _round_up(a, b):
    return _cdiv(a, b) * b


def _vmem_budget():
    """(per-step tile-footprint budget, explicit vmem_limit_bytes)."""
    try:
        cap = int(pltpu.get_tpu_info().vmem_capacity_bytes)
    except Exception:
        cap = 64 << 20          # conservative fallback (v7x per-TC VMEM)
    limit = min(int(cap * 0.7), 80 << 20)   # headroom for Mosaic scratch
    return limit // 2, limit


def _pick_tile_m(M, N, Cin, Cout_pad, budget_bytes):
    """Largest TM whose real per-step VMEM footprint fits the budget:

        2 * (4 * TM * Cin * 2)        # double-buffered bf16 x tile
      + 2 * (TM * Cout_pad * 2)       # double-buffered bf16 out tile
      + Cin * Cout_pad * 2            # weight (re-DMA'd but constant)
      + 2 * Cin * 4                   # scale/shift

    TM prefers multiples of 256 (clean MXU passes); otherwise multiples of 8
    (sublane constraint).  TM need not divide M -- the grid uses cdiv and the
    partial last block is masked on writeback.
    """
    fixed = Cin * Cout_pad * 2 + 2 * Cin * 4
    per_row = 2 * (4 * Cin * 2) + 2 * (Cout_pad * 2)
    cap = max(8, (budget_bytes - fixed) // per_row)

    if cap >= M or M <= 8:
        tm = M                              # full extent is always legal
    elif cap >= 256:
        tm = cap - cap % 256
    else:
        tm = cap - cap % 8

    # Guarantee >= 2 total grid steps so both v7x TensorCores get work.
    if N * _cdiv(M, tm) < 2 and M > 8:
        tm = _round_up(_cdiv(M, 2), 8)
    return tm


def transition_forward(x_nchw, gamma, beta, running_mean, running_var, conv_w,
                       eps=1e-5):
    """x_nchw: (N, Cin, H, W); conv_w: (Cout, Cin, 1, 1) PyTorch layout."""
    N, Cin, H, W = x_nchw.shape
    Cout = conv_w.shape[0]
    assert H % 2 == 0 and W % 2 == 0, "AvgPool2d(2,2) needs even H, W"
    Ho, Wo = H // 2, W // 2
    M = Ho * Wo

    # Fold the BatchNorm running stats into one per-channel affine pair (f32).
    scale = gamma / jnp.sqrt(running_var + eps)
    shift = beta - running_mean * scale
    ss = jnp.stack([scale, shift]).reshape(2, 1, Cin).astype(jnp.float32)

    # 1x1 conv weight as (Cin, Cout): 2x2-avg factor folded in, bf16 for the
    # MXU, Cout padded to a lane-dense multiple of 128.
    Cout_pad = _round_up(Cout, 128)
    w_mat = (conv_w[:, :, 0, 0].T * 0.25).astype(jnp.bfloat16)    # (Cin, Cout)
    w_mat = jnp.pad(w_mat, ((0, 0), (0, Cout_pad - Cout)))

    # NCHW -> (N, 2, 2, Ho*Wo, Cin), cast to bf16 FUSED with the transpose so
    # the layout-change copy moves half the bytes; the 2x2 pool siblings
    # become outer axes, channels become lanes.
    x = x_nchw.astype(jnp.bfloat16).reshape(N, Cin, Ho, 2, Wo, 2)
    x = jnp.transpose(x, (0, 3, 5, 2, 4, 1)).reshape(N, 2, 2, M, Cin)

    tile_budget, vmem_limit = _vmem_budget()
    TM = _pick_tile_m(M, N, Cin, Cout_pad, tile_budget)
    grid = (N, _cdiv(M, TM))

    cost = pl.CostEstimate(
        flops=int(2 * N * M * Cin * Cout_pad + 6 * N * H * W * Cin),
        transcendentals=0,
        bytes_accessed=int(x.size * 2 + N * M * Cout_pad * 2
                           + w_mat.size * 2 + ss.size * 4))

    out = pl.pallas_call(
        transition_kernel,
        out_shape=jax.ShapeDtypeStruct((N, M, Cout_pad), jnp.bfloat16),
        grid=grid,
        in_specs=[
            pl.BlockSpec((1, 2, 2, TM, Cin), lambda n, m: (n, 0, 0, m, 0)),
            pl.BlockSpec((2, 1, Cin), lambda n, m: (0, 0, 0)),
            pl.BlockSpec((Cin, Cout_pad), lambda n, m: (0, 0)),
        ],
        out_specs=pl.BlockSpec((1, TM, Cout_pad), lambda n, m: (n, m, 0)),
        compiler_params=pltpu.CompilerParams(
            dimension_semantics=("parallel", "parallel"),
            vmem_limit_bytes=int(vmem_limit)),
        cost_estimate=cost,
    )(x, ss, w_mat)

    # Drop the lane padding and return NCHW (f32, matching the module output).
    out = out[:, :, :Cout].reshape(N, Ho, Wo, Cout)
    return jnp.transpose(out, (0, 3, 1, 2)).astype(jnp.float32)


def reference_forward(x_nchw, gamma, beta, running_mean, running_var, conv_w,
                      eps=1e-5):
    x = x_nchw.astype(jnp.float32)
    g = gamma.reshape(1, -1, 1, 1)
    b = beta.reshape(1, -1, 1, 1)
    m = running_mean.reshape(1, -1, 1, 1)
    v = running_var.reshape(1, -1, 1, 1)
    y = jnp.maximum((x - m) / jnp.sqrt(v + eps) * g + b, 0.0)
    z = jnp.einsum("nchw,oc->nohw", y, conv_w[:, :, 0, 0])
    N, Co, H, W = z.shape
    return z.reshape(N, Co, H // 2, 2, W // 2, 2).mean(axis=(3, 5))


if __name__ == "__main__":
    key = jax.random.PRNGKey(0)
    N, Cin, Cout, H, W = 2, 4, 2, 16, 16

    k1, k2, k3, k4, k5, k6 = jax.random.split(key, 6)
    x = jax.random.normal(k1, (N, Cin, H, W), dtype=jnp.float32)
    gamma = jax.random.normal(k2, (Cin,), dtype=jnp.float32) * 0.1 + 1.0
    beta = jax.random.normal(k3, (Cin,), dtype=jnp.float32) * 0.1
    running_mean = jax.random.normal(k4, (Cin,), dtype=jnp.float32) * 0.1
    running_var = jax.random.uniform(k5, (Cin,), dtype=jnp.float32,
                                     minval=0.5, maxval=1.5)
    conv_w = jax.random.normal(k6, (Cout, Cin, 1, 1), dtype=jnp.float32) * 0.2

    out = transition_forward(x, gamma, beta, running_mean, running_var, conv_w)
    out = jax.block_until_ready(out)

    ref = reference_forward(x, gamma, beta, running_mean, running_var, conv_w)
    assert out.shape == (N, Cout, H // 2, W // 2), out.shape
    # bf16 activations / weight / output (f32 accumulate): relaxed tolerance
    # vs the f32 reference.
    assert jnp.allclose(out, ref, atol=5e-2, rtol=5e-2), \
        float(jnp.max(jnp.abs(out - ref)))

    print("KERNEL_OK")
</pallas_src>

<mosaic_0001>
module attributes {stable_mosaic.version = 11 : i64} {
  func.func @transition_kernel(%arg0: i32, %arg1: i32, %arg2: memref<1x2x2x64x4xbf16, #tpu.memory_space<vmem>>, %arg3: memref<2x1x4xf32, #tpu.memory_space<vmem>>, %arg4: memref<4x128xbf16, #tpu.memory_space<vmem>>, %arg5: memref<1x64x128xbf16, #tpu.memory_space<vmem>>) attributes {dimension_semantics = [#tpu.dimension_semantics<parallel>, #tpu.dimension_semantics<parallel>], iteration_bounds = array<i64: 2, 1>, scalar_prefetch = 0 : i64, scratch_operands = 0 : i64, tpu.core_type = #tpu.core_type<tc>, window_params = [{transform_indices = @transform_0, window_bounds = array<i64: 1, 2, 2, 64, 4>}, {pipeline_mode = #tpu.pipeline_mode<synchronous>, transform_indices = @transform_1, window_bounds = array<i64: 2, 1, 4>}, {pipeline_mode = #tpu.pipeline_mode<synchronous>, transform_indices = @transform_2, window_bounds = array<i64: 4, 128>}, {transform_indices = @transform_3, window_bounds = array<i64: 1, 64, 128>}]} {
    %c0 = arith.constant 0 : index
    %c0_0 = arith.constant 0 : index
    %c0_1 = arith.constant 0 : index
    %0 = vector.load %arg3[%c0, %c0_0, %c0_1] : memref<2x1x4xf32, #tpu.memory_space<vmem>>, vector<1x1x4xf32>
    %1 = vector.shape_cast %0 : vector<1x1x4xf32> to vector<1x4xf32>
    %c1 = arith.constant 1 : index
    %c0_2 = arith.constant 0 : index
    %c0_3 = arith.constant 0 : index
    %2 = vector.load %arg3[%c1, %c0_2, %c0_3] : memref<2x1x4xf32, #tpu.memory_space<vmem>>, vector<1x1x4xf32>
    %3 = vector.shape_cast %2 : vector<1x1x4xf32> to vector<1x4xf32>
    %c0_4 = arith.constant 0 : index
    %c0_5 = arith.constant 0 : index
    %c0_6 = arith.constant 0 : index
    %c0_7 = arith.constant 0 : index
    %c0_8 = arith.constant 0 : index
    %4 = vector.load %arg2[%c0_4, %c0_5, %c0_6, %c0_7, %c0_8] : memref<1x2x2x64x4xbf16, #tpu.memory_space<vmem>>, vector<1x1x1x64x4xbf16>
    %5 = vector.shape_cast %4 : vector<1x1x1x64x4xbf16> to vector<64x4xbf16>
    %6 = arith.extf %5 : vector<64x4xbf16> to vector<64x4xf32>
    %7 = vector.broadcast %1 : vector<1x4xf32> to vector<64x4xf32>
    %8 = arith.mulf %6, %7 : vector<64x4xf32>
    %9 = vector.broadcast %3 : vector<1x4xf32> to vector<64x4xf32>
    %10 = arith.addf %8, %9 : vector<64x4xf32>
    %cst = arith.constant 0.000000e+00 : f32
    %11 = vector.broadcast %cst : f32 to vector<64x4xf32>
    %12 = arith.maximumf %10, %11 : vector<64x4xf32>
    %c0_9 = arith.constant 0 : index
    %c0_10 = arith.constant 0 : index
    %c1_11 = arith.constant 1 : index
    %c0_12 = arith.constant 0 : index
    %c0_13 = arith.constant 0 : index
    %13 = vector.load %arg2[%c0_9, %c0_10, %c1_11, %c0_12, %c0_13] : memref<1x2x2x64x4xbf16, #tpu.memory_space<vmem>>, vector<1x1x1x64x4xbf16>
    %14 = vector.shape_cast %13 : vector<1x1x1x64x4xbf16> to vector<64x4xbf16>
    %15 = arith.extf %14 : vector<64x4xbf16> to vector<64x4xf32>
    %16 = vector.broadcast %1 : vector<1x4xf32> to vector<64x4xf32>
    %17 = arith.mulf %15, %16 : vector<64x4xf32>
    %18 = vector.broadcast %3 : vector<1x4xf32> to vector<64x4xf32>
    %19 = arith.addf %17, %18 : vector<64x4xf32>
    %cst_14 = arith.constant 0.000000e+00 : f32
    %20 = vector.broadcast %cst_14 : f32 to vector<64x4xf32>
    %21 = arith.maximumf %19, %20 : vector<64x4xf32>
    %22 = arith.addf %12, %21 : vector<64x4xf32>
    %c0_15 = arith.constant 0 : index
    %c1_16 = arith.constant 1 : index
    %c0_17 = arith.constant 0 : index
    %c0_18 = arith.constant 0 : index
    %c0_19 = arith.constant 0 : index
    %23 = vector.load %arg2[%c0_15, %c1_16, %c0_17, %c0_18, %c0_19] : memref<1x2x2x64x4xbf16, #tpu.memory_space<vmem>>, vector<1x1x1x64x4xbf16>
    %24 = vector.shape_cast %23 : vector<1x1x1x64x4xbf16> to vector<64x4xbf16>
    %25 = arith.extf %24 : vector<64x4xbf16> to vector<64x4xf32>
    %26 = vector.broadcast %1 : vector<1x4xf32> to vector<64x4xf32>
    %27 = arith.mulf %25, %26 : vector<64x4xf32>
    %28 = vector.broadcast %3 : vector<1x4xf32> to vector<64x4xf32>
    %29 = arith.addf %27, %28 : vector<64x4xf32>
    %cst_20 = arith.constant 0.000000e+00 : f32
    %30 = vector.broadcast %cst_20 : f32 to vector<64x4xf32>
    %31 = arith.maximumf %29, %30 : vector<64x4xf32>
    %32 = arith.addf %22, %31 : vector<64x4xf32>
    %c0_21 = arith.constant 0 : index
    %c1_22 = arith.constant 1 : index
    %c1_23 = arith.constant 1 : index
    %c0_24 = arith.constant 0 : index
    %c0_25 = arith.constant 0 : index
    %33 = vector.load %arg2[%c0_21, %c1_22, %c1_23, %c0_24, %c0_25] : memref<1x2x2x64x4xbf16, #tpu.memory_space<vmem>>, vector<1x1x1x64x4xbf16>
    %34 = vector.shape_cast %33 : vector<1x1x1x64x4xbf16> to vector<64x4xbf16>
    %35 = arith.extf %34 : vector<64x4xbf16> to vector<64x4xf32>
    %36 = vector.broadcast %1 : vector<1x4xf32> to vector<64x4xf32>
    %37 = arith.mulf %35, %36 : vector<64x4xf32>
    %38 = vector.broadcast %3 : vector<1x4xf32> to vector<64x4xf32>
    %39 = arith.addf %37, %38 : vector<64x4xf32>
    %cst_26 = arith.constant 0.000000e+00 : f32
    %40 = vector.broadcast %cst_26 : f32 to vector<64x4xf32>
    %41 = arith.maximumf %39, %40 : vector<64x4xf32>
    %42 = arith.addf %32, %41 : vector<64x4xf32>
    %43 = arith.truncf %42 : vector<64x4xf32> to vector<64x4xbf16>
    %c0_27 = arith.constant 0 : index
    %c0_28 = arith.constant 0 : index
    %44 = vector.load %arg4[%c0_27, %c0_28] : memref<4x128xbf16, #tpu.memory_space<vmem>>, vector<4x128xbf16>
    %cst_29 = arith.constant dense<0.000000e+00> : vector<64x128xf32>
    %45 = tpu.matmul %43, %44, %cst_29 {dimension_numbers = #tpu.dot_dimension_numbers<[1], [0], [0], [1], [0, 0, 1, 1], [], []>} : vector<64x4xbf16>, vector<4x128xbf16>, vector<64x128xf32> -> vector<64x128xf32>
    %46 = arith.truncf %45 : vector<64x128xf32> to vector<64x128xbf16>
    %c0_30 = arith.constant 0 : index
    %c0_31 = arith.constant 0 : index
    %c0_32 = arith.constant 0 : index
    %47 = vector.load %arg5[%c0_30, %c0_31, %c0_32] : memref<1x64x128xbf16, #tpu.memory_space<vmem>>, vector<1x64x128xbf16>
    %48 = vector.shape_cast %47 : vector<1x64x128xbf16> to vector<64x128xbf16>
    %49 = vector.shape_cast %46 : vector<64x128xbf16> to vector<1x64x128xbf16>
    tpu.vector_store %arg5[%c0_30, %c0_31, %c0_32], %49 {strides = array<i32>} : memref<1x64x128xbf16, #tpu.memory_space<vmem>>, vector<1x64x128xbf16>,
    return
  }
  func.func @transform_0(%arg0: i32, %arg1: i32) -> (i32, i32, i32, i32, i32) {
    %c0_i32 = arith.constant 0 : i32
    %c0_i32_0 = arith.constant 0 : i32
    %c0_i32_1 = arith.constant 0 : i32
    %c0_i32_2 = arith.constant 0 : i32
    return %arg0, %c0_i32, %c0_i32_0, %arg1, %c0_i32_1 : i32, i32, i32, i32, i32
  }
  func.func @transform_1(%arg0: i32, %arg1: i32) -> (i32, i32, i32) {
    %c0_i32 = arith.constant 0 : i32
    %c0_i32_0 = arith.constant 0 : i32
    %c0_i32_1 = arith.constant 0 : i32
    %c0_i32_2 = arith.constant 0 : i32
    return %c0_i32, %c0_i32_0, %c0_i32_1 : i32, i32, i32
  }
  func.func @transform_2(%arg0: i32, %arg1: i32) -> (i32, i32) {
    %c0_i32 = arith.constant 0 : i32
    %c0_i32_0 = arith.constant 0 : i32
    %c0_i32_1 = arith.constant 0 : i32
    return %c0_i32, %c0_i32_0 : i32, i32
  }
  func.func @transform_3(%arg0: i32, %arg1: i32) -> (i32, i32, i32) {
    %c0_i32 = arith.constant 0 : i32
    %c0_i32_0 = arith.constant 0 : i32
    return %arg0, %arg1, %c0_i32 : i32, i32, i32
  }
}

</mosaic_0001>

<bundles_post_ra>
// kernel: tpu_custom_call.1
= control target key start
LH: loop header
LB: loop body
LE: loop exit
PB: predicated region body
PF: predicated region fallthrough
CT: control target
= control target key end

     0   :  { %8 = vsyncpa [#allocation3], 0  ;;  %s1067_s0 = inlined_call_operand.vmem [shape: bf16[2,2,2,64,4], index: 0, kind: input, shape index: {}]   ;;  %s1068_s1 = inlined_call_operand.vmem [shape: f32[2,1,4], index: 1, kind: input, shape index: {}]   ;;  %s1069_s2 = inlined_call_operand.vmem [shape: bf16[4,128], index: 2, kind: input, shape index: {}]   ;;  %s1070_s3 = inlined_call_operand.hbm [shape: bf16[2,64,128], index: 3, kind: output, shape index: {}]  }
   0x1   :  { %10 = vsyncpa [#allocation3 + $0x1], 0  ;;  %s871_s12 = smov 0   ;;  %s873_s13 = smov 0  }
   0x2   :  { %s875_s14 = smov 0   ;;  %s877_s15 = smov 0  }
   0x3   :  { %s879_s16 = smov 0   ;;  %s881_s17 = smov 0  }
   0x4 LB: > { %s561_s18 = sadd.s32 4294967295, %s847_s17   ;;  %s562_s19 = sadd.s32 4294967294, %s847_s17   ;;  %s847_s17 = sphi %s881_s17, %s16_s17   ;;  %s843_s16 = sphi %s879_s16, %s1077_s16   ;;  %s839_s15 = sphi %s877_s15, %s1076_s15   ;;  %s835_s14 = sphi %s875_s14, %s1075_s14   ;;  %s831_s13 = sphi %s873_s13, %s1074_s13   ;;  %s827_s12 = sphi %s871_s12, %s1073_s12  }
   0x5   : > { %s28_s20 = sadd.s32 1, %s843_s16  ;;  %s107_s21 = sadd.s32 1, %s835_s14 }
   0x6   : > { %p30_p0 = scmp.ge.s32.totalorder %s28_s20, 2  ;;  %p117_p1 = scmp.ne.s32.totalorder %s835_s14, %s831_s13 }
   0x7   : > { %p118_p2 = scmp.eq.s32.totalorder %s561_s18, 1  ;;  %p123_p3 = scmp.ne.s32.totalorder %s831_s13, %s827_s12 }
   0x8   : > { %s1079_s20 = smov (%p30_p0, %s28_s20), 0  ;;  %p124_p5 = scmp.eq.s32.totalorder %s562_s19, 1 }
   0x9   : > { %p911_p4 = por %p118_p2, %p117_p1  ;;  %s102_s23 = ssub.s32 %s843_s16, %s1079_s20 }
   0xa   : > { %p565_p6 = scmp.ge.s32.totalorder %s847_s17, 1  ;;  %p105_p7 = scmp.eq.s32.totalorder %s102_s23, 0 }
   0xb   : > { %p918_p8 = por %p124_p5, %p123_p3  ;;  %p161_p9 = scmp.lt.s32.totalorder %s847_s17, 3 }
   0xc   : > { %s924_s25 = scalar_select %p105_p7, %s835_s14, %s107_s21  }
   0xd   : > { %p162_p10 = pnand %p565_p6, %p161_p9 }
   0xe   : > { %p190_p11 = scmp.lt.s32.totalorder (!%p162_p10), %s839_s15, 1  ;;  %s186_s10 = sand.u32 (!%p162_p10), 1, %s831_s13  }
   0xf   : > { %165 = sbr.rel (%p162_p10) target bundleno = 217 (0xd9), region = 32  ;;  %s566_s11 = sshll.u32 (!%p162_p10), %s186_s10, 5 }
  0x10   : > { %s188_s18 = scalar_lea.vmem (!%p162_p10), [#allocation2], %s566_s11  ;;  %s604_s19 = sshll.u32 (!%p162_p10), %s839_s15, 5 }
  0x11   : > { %s478_s26 = scalar_lea.hbm (!%p162_p10), %s1070_s3, %s604_s19  ;;  %s479_s27 = sshll.u32 (!%p162_p10), %s188_s18, 4  ;;  %s480_s27 = int_to_ptr.vmem [resolvable:$true] %s479_s27 }
  0x12   : > { %s789_s6 = scalar_lea.hbm (!%p162_p10), %s1070_s3, 64 }
  0x14   : > { %v401_v0 = vld [vmem:[%s1069_s2] sm:$0x3]  ;;  %vm415_vm0 = vcmask 1041408   ;;  %s191_s28 = scalar_select %p190_p11, %s839_s15, 1  ;;  %vm402_vm1 = vcmask 31744  }
  0x15   : > { %v417_v1 = vsel %vm415_vm0, %v401_v0, 0  ;;  %v939_v2 = vld [vmem:[%s1068_s1] ss:$0 sm:$0xff]  ;;  %v947_v8 = vld [vmem:[%s1068_s1 + $0x1] ss:$0 sm:$0xff] }
  0x16   : > { %426 = vmatpush.bf16.msra.mxu0 %v417_v1  ;;  %707 = vmatpush.bf16.msra.mxu1 %v417_v1  ;;  %s603_s29 = sshll.u32 %s191_s28, 7  ;;  %s481_s28 = sshll.u32 %s478_s26, 4  ;;  %s482_s28 = int_to_ptr.hbm [resolvable:$true] %s481_s28 }
  0x17   : > { %708 = vmatpush.bf16.msra.mxu2 %v417_v1  ;;  %709 = vmatpush.bf16.msra.mxu3 %v417_v1  ;;  %s934_s5 = scalar_lea.vmem %s1067_s0, %s603_s29  ;;  %s465_s29 = scalar_lea.sflag [#allocation3], %s186_s10 }
  0x18   : > { %v606_v3 = vld [vmem:[%s934_s5] sm:$0xff]   ;;  %v689_v32 = vld [vmem:[%s934_s5 + $0x8] sm:$0xff]   ;;  %s783_s30 = sshra.s32 %s482_s28, 4  ;;  %s784_s30 = int_to_ptr.hbm [resolvable:$true] %s783_s30 }
  0x19   : > { %v692_v4 = vld [vmem:[%s934_s5 + $0x20] sm:$0xff]   ;;  %v607_v6 = vunpack.c.l.bf16 %v606_v3  ;;  %v608_v7 = vunpack.c.h.bf16 %v606_v3  ;;  %v693_v37 = vld [vmem:[%s934_s5 + $0x28] sm:$0xff]   ;;  %v611_v45 = vunpack.c.l.bf16 %v689_v32  ;;  %v612_v46 = vunpack.c.h.bf16 %v689_v32  ;;  %s785_s4 = scalar_lea.hbm %s784_s30, 32  ;;  %p790_p1 = scmp.lt.s32.totalorder %s784_s30, %s1070_s3 }
  0x1a   : > { %v696_v5 = vld [vmem:[%s934_s5 + $0x40] sm:$0xff]   ;;  %v623_v9 = vunpack.c.l.bf16 %v692_v4  ;;  %v624_v10 = vunpack.c.h.bf16 %v692_v4  ;;  %v697_v38 = vld [vmem:[%s934_s5 + $0x48] sm:$0xff]   ;;  %v627_v47 = vunpack.c.l.bf16 %v693_v37  ;;  %v628_v48 = vunpack.c.h.bf16 %v693_v37  ;;  %p786_p12 = scmp.ne.s32.totalorder %s784_s30, %s785_s4  ;;  %p791_p2 = scmp.lt.s32.totalorder %s789_s6, %s785_s4 }
  0x1b   : > { %v700_v11 = vld [vmem:[%s934_s5 + $0x60] sm:$0xff]   ;;  %v639_v12 = vunpack.c.l.bf16 %v696_v5  ;;  %v640_v13 = vunpack.c.h.bf16 %v696_v5  ;;  %v223_v16 = vmul.f32 %v939_v2, %v607_v6  ;;  %v224_v17 = vmul.f32 %v939_v2, %v608_v7  ;;  %v701_v59 = vld [vmem:[%s934_s5 + $0x68] sm:$0xff]   ;;  %v690_v5 = vld [vmem:[%s934_s5 + $0x10] sm:$0xff]  }
  0x1c   : > { %v655_v14 = vunpack.c.l.bf16 %v700_v11  ;;  %v656_v15 = vunpack.c.h.bf16 %v700_v11  ;;  %v267_v18 = vmul.f32 %v939_v2, %v623_v9  ;;  %v268_v19 = vmul.f32 %v939_v2, %v624_v10  ;;  %v694_v11 = vld [vmem:[%s934_s5 + $0x30] sm:$0xff]   ;;  %p787_p13 = pnand %p786_p12, %p911_p4  ;;  %p792_p3 = por %p791_p2, %p790_p1 }
  0x1d   : > { %v316_v20 = vmul.f32 %v939_v2, %v639_v12  ;;  %v317_v21 = vmul.f32 %v939_v2, %v640_v13  ;;  %v234_v24 = vadd.f32 %v947_v8, %v223_v16  ;;  %v235_v25 = vadd.f32 %v947_v8, %v224_v17 }
  0x1e   : > { %v365_v22 = vmul.f32 %v939_v2, %v655_v14  ;;  %v366_v23 = vmul.f32 %v939_v2, %v656_v15  ;;  %v275_v26 = vadd.f32 %v947_v8, %v267_v18  ;;  %v276_v27 = vadd.f32 %v947_v8, %v268_v19  ;;  %p788_p0 = pneg %p787_p13 }
  0x1f   : > { %v324_v28 = vadd.f32 %v947_v8, %v316_v20  ;;  %v325_v29 = vadd.f32 %v947_v8, %v317_v21  ;;  %v242_v33 = vmax.f32 %v234_v24, 0.0  ;;  %v243_v34 = vmax.f32 %v235_v25, 0.0 }
  0x20   : > { %v373_v30 = vadd.f32 %v947_v8, %v365_v22  ;;  %v374_v31 = vadd.f32 %v947_v8, %v366_v23  ;;  %v283_v35 = vmax.f32 %v275_v26, 0.0  ;;  %v284_v36 = vmax.f32 %v276_v27, 0.0  ;;  %p793_p5 = pnand %p792_p3, %p788_p0 }
  0x21   : > { %v332_v39 = vmax.f32 %v324_v28, 0.0  ;;  %v333_v40 = vmax.f32 %v325_v29, 0.0  ;;  %v643_v49 = vunpack.c.l.bf16 %v697_v38  ;;  %v644_v50 = vunpack.c.h.bf16 %v697_v38  ;;  %v698_v28 = vld [vmem:[%s934_s5 + $0x50] sm:$0xff]  }
  0x22   : > { %v381_v41 = vmax.f32 %v373_v30, 0.0  ;;  %v382_v42 = vmax.f32 %v374_v31, 0.0  ;;  %v291_v43 = vadd.f32 %v283_v35, %v242_v33  ;;  %v292_v44 = vadd.f32 %v284_v36, %v243_v34 }
  0x23   : > { %v225_v53 = vmul.f32 %v939_v2, %v611_v45  ;;  %v226_v54 = vmul.f32 %v939_v2, %v612_v46  ;;  %v269_v55 = vmul.f32 %v939_v2, %v627_v47  ;;  %v270_v56 = vmul.f32 %v939_v2, %v628_v48 }
  0x24   : > { %v340_v51 = vadd.f32 %v332_v39, %v291_v43  ;;  %v341_v52 = vadd.f32 %v333_v40, %v292_v44  ;;  %v318_v57 = vmul.f32 %v939_v2, %v643_v49  ;;  %v319_v58 = vmul.f32 %v939_v2, %v644_v50 }
  0x25   : > { %v236_v62 = vadd.f32 %v947_v8, %v225_v53  ;;  %v237_v63 = vadd.f32 %v947_v8, %v226_v54  ;;  %v277_v0 = vadd.f32 %v947_v8, %v269_v55  ;;  %v278_v1 = vadd.f32 %v947_v8, %v270_v56  ;;  %v695_v55 = vld [vmem:[%s934_s5 + $0x38] sm:$0xff]  }
  0x26   : > { %v389_v60 = vadd.f32 %v381_v41, %v340_v51  ;;  %v390_v61 = vadd.f32 %v382_v42, %v341_v52  ;;  %v326_v3 = vadd.f32 %v947_v8, %v318_v57  ;;  %v327_v4 = vadd.f32 %v947_v8, %v319_v58  ;;  %v702_v41 = vld [vmem:[%s934_s5 + $0x70] sm:$0xff]   ;;  %v691_v42 = vld [vmem:[%s934_s5 + $0x18] sm:$0xff]  }
  0x27   : > { %v244_v7 = vmax.f32 %v236_v62, 0.0  ;;  %v245_v9 = vmax.f32 %v237_v63, 0.0  ;;  %v659_v10 = vunpack.c.l.bf16 %v701_v59  ;;  %v285_v12 = vmax.f32 %v277_v0, 0.0 }
  0x28   : > { %v397_v6 = vpack.c.bf16 %v390_v61, %v389_v60  ;;  %v286_v13 = vmax.f32 %v278_v1, 0.0  ;;  %v334_v14 = vmax.f32 %v326_v3, 0.0  ;;  %v335_v15 = vmax.f32 %v327_v4, 0.0 }
  0x29   : > { %v660_v16 = vunpack.c.h.bf16 %v701_v59  ;;  %v367_v17 = vmul.f32 %v939_v2, %v659_v10  ;;  %v615_v18 = vunpack.c.l.bf16 %v690_v5  ;;  %v616_v19 = vunpack.c.h.bf16 %v690_v5  ;;  %v699_v10 = vld [vmem:[%s934_s5 + $0x58] sm:$0xff]  }
  0x2a   : > { %594 = vmatmul.msk.bf16.vlgmr.msra.gmra.mxu0 %vm402_vm1, %v397_v6  ;;  %v293_v20 = vadd.f32 %v285_v12, %v244_v7  ;;  %v294_v21 = vadd.f32 %v286_v13, %v245_v9  ;;  %v631_v22 = vunpack.c.l.bf16 %v694_v11  ;;  %v632_v23 = vunpack.c.h.bf16 %v694_v11 }
  0x2b   : > { %v368_v24 = vmul.f32 %v939_v2, %v660_v16  ;;  %v375_v25 = vadd.f32 %v947_v8, %v367_v17  ;;  %v227_v26 = vmul.f32 %v939_v2, %v615_v18  ;;  %v228_v27 = vmul.f32 %v939_v2, %v616_v19  ;;  %v703_v19 = vld [vmem:[%s934_s5 + $0x78] sm:$0xff]  }
  0x2c   : > { %v342_v29 = vadd.f32 %v334_v14, %v293_v20  ;;  %v343_v30 = vadd.f32 %v335_v15, %v294_v21  ;;  %v271_v31 = vmul.f32 %v939_v2, %v631_v22  ;;  %v272_v32 = vmul.f32 %v939_v2, %v632_v23 }
  0x2d   : > { %v376_v33 = vadd.f32 %v947_v8, %v368_v24  ;;  %v383_v34 = vmax.f32 %v375_v25, 0.0  ;;  %v238_v35 = vadd.f32 %v947_v8, %v227_v26  ;;  %v239_v36 = vadd.f32 %v947_v8, %v228_v27 }
  0x2e   : > { %v279_v37 = vadd.f32 %v947_v8, %v271_v31  ;;  %v280_v38 = vadd.f32 %v947_v8, %v272_v32  ;;  %v647_v39 = vunpack.c.l.bf16 %v698_v28  ;;  %v648_v40 = vunpack.c.h.bf16 %v698_v28 }
  0x2f   : > { %v384_v43 = vmax.f32 %v376_v33, 0.0  ;;  %v391_v44 = vadd.f32 %v383_v34, %v342_v29  ;;  %v246_v45 = vmax.f32 %v238_v35, 0.0  ;;  %v247_v46 = vmax.f32 %v239_v36, 0.0 }
  0x30   : > { %v287_v47 = vmax.f32 %v279_v37, 0.0  ;;  %v288_v48 = vmax.f32 %v280_v38, 0.0  ;;  %v320_v49 = vmul.f32 %v939_v2, %v647_v39  ;;  %v321_v50 = vmul.f32 %v939_v2, %v648_v40 }
  0x31   : > { %v392_v51 = vadd.f32 %v384_v43, %v343_v30  ;;  %v663_v52 = vunpack.c.l.bf16 %v702_v41  ;;  %v664_v53 = vunpack.c.h.bf16 %v702_v41  ;;  %v619_v54 = vunpack.c.l.bf16 %v691_v42 }
  0x32   : > { %v295_v56 = vadd.f32 %v287_v47, %v246_v45  ;;  %v296_v57 = vadd.f32 %v288_v48, %v247_v46  ;;  %v328_v58 = vadd.f32 %v947_v8, %v320_v49  ;;  %v329_v59 = vadd.f32 %v947_v8, %v321_v50 }
  0x33   : > { %v398_v60 = vpack.c.bf16 %v392_v51, %v391_v44  ;;  %v369_v61 = vmul.f32 %v939_v2, %v663_v52  ;;  %v370_v62 = vmul.f32 %v939_v2, %v664_v53  ;;  %v620_v63 = vunpack.c.h.bf16 %v691_v42 }
  0x34   : > { %v336_v0 = vmax.f32 %v328_v58, 0.0  ;;  %v337_v1 = vmax.f32 %v329_v59, 0.0  ;;  %v229_v3 = vmul.f32 %v939_v2, %v619_v54  ;;  %v635_v4 = vunpack.c.l.bf16 %v695_v55 }
  0x35   : > { %595 = vmatmul.msk.bf16.vlgmr.msra.gmra.mxu1 %vm402_vm1, %v398_v60  ;;  %v377_v5 = vadd.f32 %v947_v8, %v369_v61  ;;  %v378_v6 = vadd.f32 %v947_v8, %v370_v62  ;;  %v230_v7 = vmul.f32 %v939_v2, %v620_v63  ;;  %v636_v9 = vunpack.c.h.bf16 %v695_v55 }
  0x36   : > { %v344_v11 = vadd.f32 %v336_v0, %v295_v56  ;;  %v345_v12 = vadd.f32 %v337_v1, %v296_v57  ;;  %v240_v13 = vadd.f32 %v947_v8, %v229_v3  ;;  %v273_v14 = vmul.f32 %v939_v2, %v635_v4 }
  0x37   : > { %v385_v15 = vmax.f32 %v377_v5, 0.0  ;;  %v386_v16 = vmax.f32 %v378_v6, 0.0  ;;  %v241_v17 = vadd.f32 %v947_v8, %v230_v7  ;;  %v274_v18 = vmul.f32 %v939_v2, %v636_v9 }
  0x38   : > { %v248_v20 = vmax.f32 %v240_v13, 0.0  ;;  %v281_v21 = vadd.f32 %v947_v8, %v273_v14  ;;  %v651_v22 = vunpack.c.l.bf16 %v699_v10  ;;  %v652_v23 = vunpack.c.h.bf16 %v699_v10 }
  0x39   : > { %v393_v24 = vadd.f32 %v385_v15, %v344_v11  ;;  %v394_v25 = vadd.f32 %v386_v16, %v345_v12  ;;  %v249_v26 = vmax.f32 %v241_v17, 0.0  ;;  %v282_v27 = vadd.f32 %v947_v8, %v274_v18 }
  0x3a   : > { %v289_v28 = vmax.f32 %v281_v21, 0.0  ;;  %v322_v29 = vmul.f32 %v939_v2, %v651_v22  ;;  %v323_v30 = vmul.f32 %v939_v2, %v652_v23  ;;  %v667_v31 = vunpack.c.l.bf16 %v703_v19 }
  0x3b   : > { %v399_v32 = vpack.c.bf16 %v394_v25, %v393_v24  ;;  %v290_v33 = vmax.f32 %v282_v27, 0.0  ;;  %v668_v34 = vunpack.c.h.bf16 %v703_v19 }
  0x3c   : > { %v297_v35 = vadd.f32 %v289_v28, %v248_v20  ;;  %v330_v36 = vadd.f32 %v947_v8, %v322_v29  ;;  %v331_v37 = vadd.f32 %v947_v8, %v323_v30  ;;  %v371_v38 = vmul.f32 %v939_v2, %v667_v31 }
  0x3d   : > { %596 = vmatmul.msk.bf16.vlgmr.msra.gmra.mxu2 %vm402_vm1, %v399_v32  ;;  %v298_v39 = vadd.f32 %v290_v33, %v249_v26  ;;  %v372_v40 = vmul.f32 %v939_v2, %v668_v34 }
  0x3e   : > { %v338_v41 = vmax.f32 %v330_v36, 0.0  ;;  %v339_v42 = vmax.f32 %v331_v37, 0.0  ;;  %v379_v43 = vadd.f32 %v947_v8, %v371_v38 }
  0x3f   : > { %v380_v44 = vadd.f32 %v947_v8, %v372_v40 }
  0x40   : > { %v346_v45 = vadd.f32 %v338_v41, %v297_v35  ;;  %v347_v46 = vadd.f32 %v339_v42, %v298_v39  ;;  %v387_v47 = vmax.f32 %v379_v43, 0.0 }
  0x41   : > { %v388_v48 = vmax.f32 %v380_v44, 0.0 }
  0x42   : > { %v395_v49 = vadd.f32 %v387_v47, %v346_v45 }
  0x43   : > { %v396_v50 = vadd.f32 %v388_v48, %v347_v46 }
  0x45   : > { %v400_v51 = vpack.c.bf16 %v396_v50, %v395_v49 }
  0x47   : > { %597 = vmatmul.msk.bf16.vlgmr.msra.gmra.mxu3 %vm402_vm1, %v400_v51 }
  0xa7   : > { %v428_v52 = vpop.f32.mrf.mxu0 }
  0xaf   : > { %v430_v2 = vpop.f32.mrf.mxu0 }
  0xb0   : > { %v672_v53 = vpack.c.bf16 %v430_v2, %v428_v52 }
  0xb2   : > { %673 = vst [vmem:[%s188_s18] sm:$0xff] %v672_v53   ;;  %v433_v54 = vpop.f32.mrf.mxu1 }
  0xba   : > { %v435_v55 = vpop.f32.mrf.mxu1 }
  0xbb   : > { %v677_v8 = vpack.c.bf16 %v435_v55, %v433_v54 }
  0xbd   : > { %704 = vst [vmem:[%s188_s18 + $0x8] sm:$0xff] %v677_v8  }
  0xc0   : > { %v438_v56 = vpop.f32.mrf.mxu2 }
  0xc8   : > { %v440_v57 = vpop.f32.mrf.mxu2 }
  0xc9   : > { %v682_v58 = vpack.c.bf16 %v440_v57, %v438_v56 }
  0xca   : > { %v443_v59 = vpop.f32.mrf.mxu3 }
  0xcb   : > { %705 = vst [vmem:[%s188_s18 + $0x10] sm:$0xff] %v682_v58  }
  0xd2   : > { %v445_v60 = vpop.f32.mrf.mxu3 }
  0xd3   : > { %v687_v61 = vpack.c.bf16 %v445_v60, %v443_v59 }
  0xd5   : > { %706 = vst [vmem:[%s188_s18 + $0x18] sm:$0xff] %v687_v61  }
  0xd6   : > { %796 = shalt.err (!%p793_p5)
}
  0xd7   : > { %s849_s9 = smov 64   ;;  %s850_s10 = smov 4  }
  0xd8   : > { %710 = dma.vmem_to_hbm [thread:$0]  (%p911_p4), %s480_s27, 512, %s482_s28, %s465_s29, %s849_s9, %s849_s9, %s850_s10  }
  0xd9 PF: > { %p716_p6 = scmp.ge.s32.totalorder %s847_s17, 2  ;;  %s496_s11 = sand.u32 1, %s827_s12  }
  0xda   : > { %s497_s18 = scalar_lea.sflag [#allocation3], %s496_s11 }
  0xdb   : > { %p713_p7 = pnand %p716_p6, %p918_p8 }
  0xdd   : > { %p714_p9 = pneg %p713_p7 }
  0xdf   : > { %822 = dma.done.wait (%p714_p9), %s497_s18, 512  }
  0xe0   : > { %824 = vsyncadd (%p714_p9), %s497_s18, 4294966784  ;;  %s16_s17 = sadd.s32 1, %s847_s17   ;;  %s1073_s12 = smov %s831_s13 }
  0xe1   : > { %p13_p10 = scmp.ge.s32.totalorder %s16_s17, 4   ;;  %s1074_s13 = smov %s835_s14 }
  0xe2   : > { %s1075_s14 = smov %s924_s25  ;;  %s1076_s15 = smov %s843_s16 }
  0xe3   : > { %s1077_s16 = smov %s1079_s20  ;;  %15 = sbr.rel (!%p13_p10) target bundleno = 4 (0x4), region = 71 }
  0xe8   :  { %503 = vsyncpa [#allocation3], 1 }
  0xe9   :  { %505 = vsyncpa [#allocation3 + $0x1], 1 }

</bundles_post_ra>
